<compile_context>
chip_gen: v6e
topology: v6e:2x2x1
jax: 0.10.0
libtpu: 0.0.40
codegen_flags: <defaults>
</compile_context>

<pallas_src>
import jax
import jax.numpy as jnp
from jax.experimental import pallas as pl
from jax.experimental.pallas import tpu as pltpu


def _round_up(x, m):
    return ((x + m - 1) // m) * m


def _largest_divisor_tile(total_blocks, max_blocks):
    """Largest divisor of total_blocks that is <= max_blocks (>= 1)."""
    best = 1
    for d in range(1, min(total_blocks, max_blocks) + 1):
        if total_blocks % d == 0:
            best = d
    return best


def _make_gcn_kernel(*, alpha, residual, res_pre_act, res_post_act, has_bias):
    def kernel(*refs):
        idx = 0
        adj_ref = refs[idx]; idx += 1          # (1, TM, TK) compute_dtype
        sup_ref = refs[idx]; idx += 1          # (1, TK, Fp) compute_dtype
        x_ref = None
        bias_ref = None
        if residual:
            x_ref = refs[idx]; idx += 1        # (1, TM, Fp) input dtype
        if has_bias:
            bias_ref = refs[idx]; idx += 1     # (1, Fp)
        o_ref = refs[idx]; idx += 1            # (1, TM, Fp)
        acc_ref = refs[idx]                    # (TM, Fp) f32 scratch

        k = pl.program_id(2)

        @pl.when(k == 0)
        def _():
            acc_ref[...] = jnp.zeros_like(acc_ref)

        # out_tile += adj[row_tile, k_tile] @ support[k_tile, :]   (f32 accum)
        acc_ref[...] += jnp.dot(adj_ref[0], sup_ref[0],
                                preferred_element_type=jnp.float32)

        @pl.when(k == pl.num_programs(2) - 1)
        def _():
            out = acc_ref[...]
            if has_bias:
                out = out + bias_ref[...].astype(jnp.float32)   # (1, Fp) bcast

            def leaky(v):
                return jnp.where(v > 0, v, alpha * v)

            if res_pre_act:
                out = leaky(out)
                # TODO(synk): dropout is identity in eval mode (training=False);
                # training-mode dropout would use pltpu.prng_seed / prng_random_bits.
            if residual:
                out = out + x_ref[0].astype(jnp.float32)
            if res_post_act:
                out = leaky(out)
            o_ref[0] = out.astype(o_ref.dtype)

    return kernel


def gcn_layer(x, adj, weight, bias=None, *, alpha=0.2, residual=False,
              residual_act='Pre', tile_m=1024, tile_k=512,
              compute_dtype=jnp.bfloat16, out_dtype=None,
              vmem_limit_bytes=None):
    """GCNLayer forward.

    x: (B, N, F), adj: (B, N, N), weight: (F, F), bias: optional (F,)/(1,1,F).
    tile_m / tile_k: adj row / contraction tile sizes (rounded to 128-multiple
        divisors of the padded node axis).  Footprint is O(tile_m * tile_k),
        independent of N, so defaults fit all of v5e / v6e / v7x.
    compute_dtype: HBM + MXU dtype for adj and support (bf16 halves the
        dominant adj HBM stream; accumulation stays f32).  Pass jnp.float32
        for exact f32 math.
    out_dtype: output dtype (default: x.dtype).  Pass jnp.bfloat16 to halve
        the writeback stream when downstream accepts it.
    """
    B, N, F = x.shape
    assert adj.shape == (B, N, N)
    assert weight.shape == (F, F), "GCNLayer has out_features == in_features"

    res_pre_act = residual_act in ('Pre', 'Both')
    res_post_act = residual_act in ('Post', 'Both')
    has_bias = bias is not None
    odt = x.dtype if out_dtype is None else out_dtype

    # ---- layout-friendly tiling --------------------------------------------
    Fp = _round_up(F, 128)                 # lane-dense feature axis
    Np = _round_up(N, 128)                 # node axis (adj over-pad <= 1 block)
    nb = Np // 128
    TM = _largest_divisor_tile(nb, max(1, _round_up(tile_m, 128) // 128)) * 128
    TK = _largest_divisor_tile(nb, max(1, _round_up(tile_k, 128) // 128)) * 128
    num_i = Np // TM
    num_k = Np // TK

    # ---- HBM-side preparation (cast first so any padded copy is narrow) -----
    adj_c = adj if adj.dtype == compute_dtype else adj.astype(compute_dtype)
    if Np != N:
        adj_c = jnp.pad(adj_c, ((0, 0), (0, Np - N), (0, Np - N)))

    # support = x @ W hoisted out of the kernel (O(N*F^2), cheap); f32 accum,
    # then stored in compute_dtype so the kernel-side stream matches adj.
    support = jnp.einsum('bnf,fg->bng', x, weight,
                         preferred_element_type=jnp.float32).astype(compute_dtype)
    if Np != N or Fp != F:
        support = jnp.pad(support, ((0, 0), (0, Np - N), (0, Fp - F)))

    in_specs = [
        # adj: one (TM, TK) tile per step.
        pl.BlockSpec((1, TM, TK), lambda b, i, k: (b, i, k)),
        # support: one (TK, Fp) tile per step.
        pl.BlockSpec((1, TK, Fp), lambda b, i, k: (b, k, 0)),
    ]
    inputs = [adj_c, support]

    if residual:
        xp = x
        if Np != N or Fp != F:
            xp = jnp.pad(x, ((0, 0), (0, Np - N), (0, Fp - F)))
        in_specs.append(pl.BlockSpec((1, TM, Fp), lambda b, i, k: (b, i, 0)))
        inputs.append(xp)

    if has_bias:
        bp = jnp.reshape(bias, (1, F))
        if Fp != F:
            bp = jnp.pad(bp, ((0, 0), (0, Fp - F)))
        in_specs.append(pl.BlockSpec((1, Fp), lambda b, i, k: (0, 0)))
        inputs.append(bp)

    # ---- VMEM budget / cost estimate ---------------------------------------
    cmp_item = jnp.dtype(compute_dtype).itemsize
    out_item = jnp.dtype(odt).itemsize
    x_item = jnp.dtype(x.dtype).itemsize
    est = (2 * TM * TK * cmp_item          # adj double buffer
           + 2 * TK * Fp * cmp_item        # support double buffer
           + 2 * TM * Fp * out_item        # output double buffer
           + TM * Fp * 4)                  # f32 accumulator scratch
    if residual:
        est += 2 * TM * Fp * x_item
    if has_bias:
        est += 2 * Fp * jnp.dtype(inputs[-1].dtype).itemsize

    if vmem_limit_bytes is None:
        try:
            info = pltpu.get_tpu_info()
            cap = getattr(info, "vmem_capacity_bytes", 64 << 20) - (8 << 20)
        except Exception:
            cap = 56 << 20                 # conservative: v7x has 64 MiB / TC
        vmem_limit_bytes = max(32 << 20, min(cap, 2 * est))

    cost = pl.CostEstimate(
        flops=2 * B * Np * Np * Fp,
        transcendentals=0,
        bytes_accessed=(B * Np * Np * cmp_item            # adj read
                        + B * num_i * Np * Fp * cmp_item  # support re-read per row tile
                        + B * Np * Fp * out_item          # output writeback
                        + (B * Np * Fp * x_item if residual else 0)),
    )

    kernel = _make_gcn_kernel(
        alpha=alpha, residual=residual, res_pre_act=res_pre_act,
        res_post_act=res_post_act, has_bias=has_bias)

    out_p = pl.pallas_call(
        kernel,
        out_shape=jax.ShapeDtypeStruct((B, Np, Fp), odt),
        grid_spec=pltpu.PrefetchScalarGridSpec(
            num_scalar_prefetch=0,
            grid=(B, num_i, num_k),
            in_specs=in_specs,
            out_specs=pl.BlockSpec((1, TM, Fp), lambda b, i, k: (b, i, 0)),
            scratch_shapes=[pltpu.VMEM((TM, Fp), jnp.float32)],
        ),
        compiler_params=pltpu.CompilerParams(
            dimension_semantics=("parallel", "parallel", "arbitrary"),
            vmem_limit_bytes=int(vmem_limit_bytes)),
        cost_estimate=cost,
    )(*inputs)

    if Np != N or Fp != F:
        out_p = out_p[:, :N, :F]
    return out_p


# ----------------------------- reference / demo -------------------------------

def _xavier_uniform(key, shape, gain):
    fan_in, fan_out = shape
    bound = gain * (6.0 / (fan_in + fan_out)) ** 0.5
    return jax.random.uniform(key, shape, jnp.float32, -bound, bound)


def _reference(x, adj, weight, bias, alpha, residual, residual_act):
    support = jnp.einsum('bnf,fg->bng', x, weight)
    out = jnp.einsum('bnm,bmf->bnf', adj, support)
    if bias is not None:
        out = out + jnp.reshape(bias, (1, 1, -1))
    leaky = lambda v: jnp.where(v > 0, v, alpha * v)
    if residual_act in ('Pre', 'Both'):
        out = leaky(out)
    if residual:
        out = out + x
    if residual_act in ('Post', 'Both'):
        out = leaky(out)
    return out


def _make_adj(key, B, N):
    a = jax.random.uniform(key, (B, N, N), jnp.float32) + jnp.eye(N)[None]
    return a / jnp.sum(a, axis=-1, keepdims=True)


if __name__ == "__main__":
    key = jax.random.PRNGKey(0)
    k_w, k_x, k_a, k_b = jax.random.split(key, 4)

    B, N, F = 2, 8, 32       # batch, num nodes, in_features (= out_features)
    alpha = 0.2              # LeakyReLU negative slope
    dropout = 0.5            # unused: eval mode -> dropout is identity

    weight = _xavier_uniform(k_w, (F, F), gain=1.414)
    x = jax.random.normal(k_x, (B, N, F), jnp.float32)
    adj = _make_adj(k_a, B, N)

    # 1) default module config, exact f32 compute path
    out = jax.block_until_ready(
        gcn_layer(x, adj, weight, alpha=alpha, residual=False,
                  residual_act='Pre', compute_dtype=jnp.float32))
    ref = _reference(x, adj, weight, None, alpha, False, 'Pre')
    assert out.shape == (B, N, F)
    assert jnp.allclose(out, ref, atol=1e-5, rtol=1e-5)

    # 2) same config, bf16 adj/support in HBM + MXU, f32 accumulation
    out_bf16 = jax.block_until_ready(
        gcn_layer(x, adj, weight, alpha=alpha, residual=False,
                  residual_act='Pre', compute_dtype=jnp.bfloat16))
    assert jnp.allclose(out_bf16, ref, atol=5e-2, rtol=5e-2)

    # 3) multi-tile path (3 row tiles x 3 k tiles) with residual + bias + 'Both'
    N2 = 300
    x2 = jax.random.normal(k_x, (B, N2, F), jnp.float32)
    adj2 = _make_adj(k_a, B, N2)
    bias = 0.1 * jax.random.normal(k_b, (F,), jnp.float32)
    out2 = jax.block_until_ready(
        gcn_layer(x2, adj2, weight, bias, alpha=alpha, residual=True,
                  residual_act='Both', tile_m=128, tile_k=128,
                  compute_dtype=jnp.float32))
    ref2 = _reference(x2, adj2, weight, bias, alpha, True, 'Both')
    assert out2.shape == (B, N2, F)
    assert jnp.allclose(out2, ref2, atol=1e-5, rtol=1e-5)

    print("KERNEL_OK")
</pallas_src>

<mosaic_0001>
module attributes {stable_mosaic.version = 11 : i64} {
  func.func @kernel(%arg0: i32, %arg1: i32, %arg2: i32, %arg3: memref<1x128x128xf32, #tpu.memory_space<vmem>>, %arg4: memref<1x128x128xf32, #tpu.memory_space<vmem>>, %arg5: memref<1x128x128xf32, #tpu.memory_space<vmem>>, %arg6: memref<128x128xf32, #tpu.memory_space<vmem>>) attributes {dimension_semantics = [#tpu.dimension_semantics<parallel>, #tpu.dimension_semantics<parallel>, #tpu.dimension_semantics<arbitrary>], iteration_bounds = array<i64: 2, 1, 1>, scalar_prefetch = 0 : i64, scratch_operands = 1 : i64, tpu.core_type = #tpu.core_type<tc>, window_params = [{transform_indices = @transform_0, window_bounds = array<i64: 1, 128, 128>}, {transform_indices = @transform_1, window_bounds = array<i64: 1, 128, 128>}, {transform_indices = @transform_2, window_bounds = array<i64: 1, 128, 128>}]} {
    %c0_i32 = arith.constant 0 : i32
    %0 = arith.cmpi eq, %arg2, %c0_i32 : i32
    %1 = arith.extui %0 : i1 to i32
    %c0_i32_0 = arith.constant 0 : i32
    %2 = arith.cmpi ne, %1, %c0_i32_0 : i32
    scf.if %2 {
      %cst_12 = arith.constant 0.000000e+00 : f32
      %14 = vector.broadcast %cst_12 : f32 to vector<128x128xf32>
      %c0_13 = arith.constant 0 : index
      %c0_14 = arith.constant 0 : index
      %15 = vector.load %arg6[%c0_13, %c0_14] : memref<128x128xf32, #tpu.memory_space<vmem>>, vector<128x128xf32>
      tpu.vector_store %arg6[%c0_13, %c0_14], %14 {strides = array<i32>} : memref<128x128xf32, #tpu.memory_space<vmem>>, vector<128x128xf32>,
    } else {
    }
    %c0 = arith.constant 0 : index
    %c0_1 = arith.constant 0 : index
    %3 = vector.load %arg6[%c0, %c0_1] : memref<128x128xf32, #tpu.memory_space<vmem>>, vector<128x128xf32>
    %c0_2 = arith.constant 0 : index
    %c0_3 = arith.constant 0 : index
    %c0_4 = arith.constant 0 : index
    %4 = vector.load %arg3[%c0_2, %c0_3, %c0_4] : memref<1x128x128xf32, #tpu.memory_space<vmem>>, vector<1x128x128xf32>
    %5 = vector.shape_cast %4 : vector<1x128x128xf32> to vector<128x128xf32>
    %c0_5 = arith.constant 0 : index
    %c0_6 = arith.constant 0 : index
    %c0_7 = arith.constant 0 : index
    %6 = vector.load %arg4[%c0_5, %c0_6, %c0_7] : memref<1x128x128xf32, #tpu.memory_space<vmem>>, vector<1x128x128xf32>
    %7 = vector.shape_cast %6 : vector<1x128x128xf32> to vector<128x128xf32>
    %cst = arith.constant dense<0.000000e+00> : vector<128x128xf32>
    %8 = tpu.matmul %5, %7, %cst {dimension_numbers = #tpu.dot_dimension_numbers<[1], [0], [0], [1], [0, 0, 1, 1], [], []>} : vector<128x128xf32>, vector<128x128xf32>, vector<128x128xf32> -> vector<128x128xf32>
    %9 = arith.addf %3, %8 : vector<128x128xf32>
    %c0_8 = arith.constant 0 : index
    %c0_9 = arith.constant 0 : index
    %10 = vector.load %arg6[%c0_8, %c0_9] : memref<128x128xf32, #tpu.memory_space<vmem>>, vector<128x128xf32>
    tpu.vector_store %arg6[%c0_8, %c0_9], %9 {strides = array<i32>} : memref<128x128xf32, #tpu.memory_space<vmem>>, vector<128x128xf32>,
    %c0_i32_10 = arith.constant 0 : i32
    %11 = arith.cmpi eq, %arg2, %c0_i32_10 : i32
    %12 = arith.extui %11 : i1 to i32
    %c0_i32_11 = arith.constant 0 : i32
    %13 = arith.cmpi ne, %12, %c0_i32_11 : i32
    scf.if %13 {
      %c0_12 = arith.constant 0 : index
      %c0_13 = arith.constant 0 : index
      %14 = vector.load %arg6[%c0_12, %c0_13] : memref<128x128xf32, #tpu.memory_space<vmem>>, vector<128x128xf32>
      %cst_14 = arith.constant 0.000000e+00 : f32
      %15 = vector.broadcast %cst_14 : f32 to vector<128x128xf32>
      %16 = arith.cmpf ogt, %14, %15 : vector<128x128xf32>
      %cst_15 = arith.constant 2.000000e-01 : f32
      %17 = vector.broadcast %cst_15 : f32 to vector<128x128xf32>
      %18 = arith.mulf %17, %14 : vector<128x128xf32>
      %19 = arith.select %16, %14, %18 : vector<128x128xi1>, vector<128x128xf32>
      %c0_16 = arith.constant 0 : index
      %c0_17 = arith.constant 0 : index
      %c0_18 = arith.constant 0 : index
      %20 = vector.load %arg5[%c0_16, %c0_17, %c0_18] : memref<1x128x128xf32, #tpu.memory_space<vmem>>, vector<1x128x128xf32>
      %21 = vector.shape_cast %20 : vector<1x128x128xf32> to vector<128x128xf32>
      %22 = vector.shape_cast %19 : vector<128x128xf32> to vector<1x128x128xf32>
      tpu.vector_store %arg5[%c0_16, %c0_17, %c0_18], %22 {strides = array<i32>} : memref<1x128x128xf32, #tpu.memory_space<vmem>>, vector<1x128x128xf32>,
    } else {
    }
    return
  }
  func.func @transform_0(%arg0: i32, %arg1: i32, %arg2: i32) -> (i32, i32, i32) {
    %c0_i32 = arith.constant 0 : i32
    return %arg0, %arg1, %arg2 : i32, i32, i32
  }
  func.func @transform_1(%arg0: i32, %arg1: i32, %arg2: i32) -> (i32, i32, i32) {
    %c0_i32 = arith.constant 0 : i32
    %c0_i32_0 = arith.constant 0 : i32
    return %arg0, %arg2, %c0_i32 : i32, i32, i32
  }
  func.func @transform_2(%arg0: i32, %arg1: i32, %arg2: i32) -> (i32, i32, i32) {
    %c0_i32 = arith.constant 0 : i32
    %c0_i32_0 = arith.constant 0 : i32
    return %arg0, %arg1, %c0_i32 : i32, i32, i32
  }
}

</mosaic_0001>

<bundles_post_ra>
// kernel: tpu_custom_call.1
= control target key start
LH: loop header
LB: loop body
LE: loop exit
PB: predicated region body
PF: predicated region fallthrough
CT: control target
= control target key end

     0   :  { %7 = vsyncpa [#allocation4], 0  ;;  %s1316_s0 = inlined_call_operand.hbm [shape: f32[2,128,128], index: 0, kind: input, shape index: {}]   ;;  %s1317_s1 = inlined_call_operand.hbm [shape: f32[2,128,128], index: 1, kind: input, shape index: {}]   ;;  %s1318_s2 = inlined_call_operand.hbm [shape: f32[2,128,128], index: 2, kind: output, shape index: {}]  }
   0x1   :  { %9 = vsyncpa [#allocation4 + $0x1], 0 }
   0x2   :  { %10 = vsyncpa [#allocation7], 0 }
   0x3   :  { %12 = vsyncpa [#allocation7 + $0x1], 0 }
   0x4   :  { %13 = vsyncpa [#allocation5], 0 }
   0x5   :  { %15 = vsyncpa [#allocation5 + $0x1], 0  ;;  %s1075_s9 = smov 0   ;;  %s1077_s10 = smov 0  }
   0x6   :  { %s1079_s11 = smov 0   ;;  %s1081_s12 = smov 0  }
   0x7   :  { %s1083_s13 = smov 0   ;;  %s1085_s14 = smov 0  }
   0x8 LB: > { %s698_s15 = sadd.s32 4294967295, %s1051_s14   ;;  %s699_s16 = sadd.s32 4294967294, %s1051_s14   ;;  %s1051_s14 = sphi %s1085_s14, %s21_s14   ;;  %s1047_s13 = sphi %s1083_s13, %s1329_s13   ;;  %s1043_s12 = sphi %s1081_s12, %s1328_s12   ;;  %s1039_s11 = sphi %s1079_s11, %s1327_s11   ;;  %s1035_s10 = sphi %s1077_s10, %s1326_s10   ;;  %s1031_s9 = sphi %s1075_s9, %s1325_s9  }
   0x9   : > { %s40_s17 = sadd.s32 1, %s1047_s13  ;;  %s51_s18 = sadd.s32 1, %s1039_s11 }
   0xa   : > { %p42_p0 = scmp.ge.s32.totalorder %s40_s17, 2  ;;  %p58_p1 = scmp.ne.s32.totalorder %s1039_s11, %s1035_s10 }
   0xb   : > { %p59_p2 = scmp.eq.s32.totalorder %s1051_s14, 0  ;;  %p64_p3 = scmp.ne.s32.totalorder %s1035_s10, %s1031_s9 }
   0xc   : > { %s1331_s17 = smov (%p42_p0, %s40_s17), 0  ;;  %p65_p5 = scmp.eq.s32.totalorder %s698_s15, 0 }
   0xd   : > { %p1116_p4 = por %p59_p2, %p58_p1  ;;  %s44_s20 = ssub.s32 %s1047_s13, %s1331_s17 }
   0xe   : > { %p118_p6 = scmp.eq.s32.totalorder %s698_s15, 1  ;;  %p49_p7 = scmp.eq.s32.totalorder %s44_s20, 0 }
   0xf   : > { %p1122_p8 = por %p65_p5, %p64_p3  ;;  %p124_p10 = scmp.eq.s32.totalorder %s699_s16, 1 }
  0x10   : > { %p1126_p9 = por %p118_p6, %p58_p1  ;;  %p701_p12 = scmp.ge.s32.totalorder %s1051_s14, 2 }
  0x11   : > { %s1131_s23 = scalar_select %p49_p7, %s1039_s11, %s51_s18  }
  0x12   : > { %p1133_p11 = por %p124_p10, %p64_p3  ;;  %p857_p13 = scmp.lt.s32.totalorder %s1051_s14, 2 }
  0x13   : > { %s1140_s25 = sand.u32 1, %s1039_s11   ;;  %s717_s27 = sshll.u32 %s1047_s13, 11 }
  0x14   : > { %s702_s26 = sshll.u32 %s1140_s25, 7  ;;  %s157_s30 = scalar_lea.hbm %s1316_s0, %s717_s27 }
  0x15   : > { %s148_s3 = scalar_lea.vmem [#allocation3], %s702_s26  ;;  %p1153_p0 = pnand %p857_p13, %p1116_p4 }
  0x16   : > { %s158_s4 = sshll.u32 %s148_s3, 4  ;;  %p708_p1 = scmp.ge.s32.totalorder %s1051_s14, 1  ;;  %s159_s4 = int_to_ptr.vmem [resolvable:$true] %s158_s4 }
  0x17   : > { %s145_s6 = scalar_lea.sflag [#allocation4], %s1140_s25  ;;  %p913_p2 = pneg %p1153_p0 }
  0x18   : > { %s924_s7 = scalar_lea.vmem %s159_s4, 2048  ;;  %s1053_s8 = smov [#allocation3]  }
  0x19   : > { %p925_p3 = scmp.ne.s32.totalorder %s159_s4, %s924_s7  ;;  %s929_s15 = sshll.u32 %s1053_s8, 4  ;;  %s930_s15 = int_to_ptr.vmem [resolvable:$false] %s929_s15 }
  0x1a   : > { %s931_s16 = scalar_lea.vmem %s930_s15, 4096  ;;  %p932_p4 = scmp.lt.s32.totalorder %s159_s4, %s930_s15 }
  0x1b   : > { %p927_p5 = pnand %p925_p3, %p913_p2  ;;  %p933_p7 = scmp.lt.s32.totalorder %s931_s16, %s924_s7 }
  0x1d   : > { %p928_p6 = pneg %p927_p5  ;;  %p934_p10 = por %p933_p7, %p932_p4 }
  0x1f   : > { %p935_p13 = pnand %p934_p10, %p928_p6 }
  0x21   : > { %938 = shalt.err (!%p935_p13)
}
  0x22   : > { %s1054_s18 = smov 128   ;;  %s1055_s19 = smov 8  }
  0x23   : > { %849 = dma.hbm_to_vmem [thread:$0]  (!%p1153_p0), %s157_s30, 2048, %s159_s4, %s145_s6, %s1054_s18, %s1054_s18, %s1055_s19  }
  0x24   : > { %p189_p3 = scmp.lt.s32.totalorder %s1051_s14, 3  ;;  %s180_s29 = scalar_lea.hbm %s1317_s1, %s717_s27 }
  0x25   : > { %s172_s7 = scalar_lea.vmem [#allocation6], %s702_s26  ;;  %s169_s15 = scalar_lea.sflag [#allocation7], %s1140_s25 }
  0x26   : > { %p1174_p5 = pnand %p708_p1, %p189_p3  ;;  %s181_s8 = sshll.u32 %s172_s7, 4  ;;  %s182_s8 = int_to_ptr.vmem [resolvable:$true] %s181_s8 }
  0x27   : > { %s952_s16 = scalar_lea.vmem %s182_s8, 2048  ;;  %s1056_s30 = smov [#allocation6]  }
  0x28   : > { %p953_p6 = scmp.ne.s32.totalorder %s182_s8, %s952_s16  ;;  %s957_s4 = sshll.u32 %s1056_s30, 4  ;;  %s958_s4 = int_to_ptr.vmem [resolvable:$false] %s957_s4 }
  0x29   : > { %s959_s27 = scalar_lea.vmem %s958_s4, 4096  ;;  %p960_p10 = scmp.lt.s32.totalorder %s182_s8, %s958_s4 }
  0x2a   : > { %p955_p4 = pnand %p953_p6, %p913_p2  ;;  %p961_p1 = scmp.lt.s32.totalorder %s959_s27, %s952_s16 }
  0x2c   : > { %p956_p7 = pneg %p955_p4  ;;  %p962_p13 = por %p961_p1, %p960_p10 }
  0x2e   : > { %p963_p3 = pnand %p962_p13, %p956_p7 }
  0x30   : > { %966 = shalt.err (!%p963_p3)
}
  0x31   : > { %852 = dma.hbm_to_vmem [thread:$0]  (!%p1153_p0), %s180_s29, 2048, %s182_s8, %s169_s15, %s1054_s18, %s1054_s18, %s1055_s19  }
  0x32   : > { %193 = sbr.rel (%p1174_p5) target bundleno = 317 (0x13d), region = 28  ;;  %s1189_s25 = sand.u32 (!%p1174_p5), 1, %s1035_s10  }
  0x33   : > { %s1192_s26 = sshll.u32 (!%p1174_p5), %s1189_s25, 7  ;;  %s196_s6 = scalar_lea.sflag (!%p1174_p5), [#allocation4], %s1189_s25 }
  0x34   : > { %s1196_s20 = scalar_lea.vmem (!%p1174_p5), [#allocation3], %s1192_s26 }
  0x37   : > { %1018 = dma.done.wait (%p1122_p8), %s196_s6, 2048  }
  0x38   : > { %1020 = vsyncadd (%p1122_p8), %s196_s6, 4294965248  ;;  %s205_s5 = scalar_lea.sflag [#allocation7], %s1189_s25  ;;  %s1204_s18 = scalar_lea.vmem [#allocation6], %s1192_s26 }
  0x39   : > { %1022 = dma.done.wait (%p1122_p8), %s205_s5, 2048  }
  0x3a   : > { %1024 = vsyncadd (%p1122_p8), %s205_s5, 4294965248  ;;  %v304_v0 = vld [vmem:[%s1204_s18 + $0x78] sm:$0xff]  ;;  %v303_v1 = vld [vmem:[%s1204_s18 + $0x70] sm:$0xff]  ;;  %s1243_s21 = scalar_lea.vmem [#allocation8], %s1192_s26  ;;  %s719_s19 = sshll.u32 %s1043_s12, 11 }
  0x3b   : > { %752 = vmatprep.subr.mxu0 %v304_v0  ;;  %808 = vmatprep.subr.mxu1 %v304_v0  ;;  %v302_v2 = vld [vmem:[%s1204_s18 + $0x68] sm:$0xff]  ;;  %v301_v3 = vld [vmem:[%s1204_s18 + $0x60] sm:$0xff]  ;;  %v300_v4 = vld [vmem:[%s1204_s18 + $0x58] sm:$0xff]  ;;  %s581_s28 = sshll.u32 %s1243_s21, 4  ;;  %s1263_s3 = scalar_lea.hbm %s1318_s2, %s719_s19  ;;  %s1265_s28 = int_to_ptr.vmem [resolvable:$true] %s581_s28 }
  0x3c   : > { %753 = vmatpush3.msra.mxu0 %v304_v0  ;;  %824 = vmatpush3.msra.mxu1 %v304_v0  ;;  %v299_v5 = vld [vmem:[%s1204_s18 + $0x50] sm:$0xff]  ;;  %v298_v6 = vld [vmem:[%s1204_s18 + $0x48] sm:$0xff]  ;;  %v297_v7 = vld [vmem:[%s1204_s18 + $0x40] sm:$0xff]  ;;  %s566_s7 = scalar_lea.sflag [#allocation5], %s1189_s25  ;;  %s967_s8 = scalar_lea.vmem %s1265_s28, 2048 }
  0x3d   : > { %754 = vmatprep.subr.mxu0 %v303_v1  ;;  %809 = vmatprep.subr.mxu1 %v303_v1  ;;  %v296_v8 = vld [vmem:[%s1204_s18 + $0x38] sm:$0xff]  ;;  %v295_v9 = vld [vmem:[%s1204_s18 + $0x30] sm:$0xff]  ;;  %v294_v10 = vld [vmem:[%s1204_s18 + $0x28] sm:$0xff]  ;;  %p968_p8 = scmp.ne.s32.totalorder %s1265_s28, %s967_s8  ;;  %s1057_s15 = smov [#allocation8]  }
  0x3e   : > { %755 = vmatpush3.msra.mxu0 %v303_v1  ;;  %825 = vmatpush3.msra.mxu1 %v303_v1  ;;  %v293_v11 = vld [vmem:[%s1204_s18 + $0x20] sm:$0xff]  ;;  %v292_v12 = vld [vmem:[%s1204_s18 + $0x18] sm:$0xff]  ;;  %v291_v13 = vld [vmem:[%s1204_s18 + $0x10] sm:$0xff]  ;;  %s971_s16 = sshll.u32 %s1057_s15, 4  ;;  %s972_s16 = int_to_ptr.vmem [resolvable:$false] %s971_s16 }
  0x3f   : > { %756 = vmatprep.subr.mxu0 %v302_v2  ;;  %810 = vmatprep.subr.mxu1 %v302_v2  ;;  %v290_v14 = vld [vmem:[%s1204_s18 + $0x8] sm:$0xff]  ;;  %v289_v15 = vld [vmem:[%s1204_s18] sm:$0xff]  ;;  %v275_v20 = vld [vmem:[%s1196_s20 + $0x10] sm:$0xff]  ;;  %p969_p0 = pnand %p968_p8, %p1126_p9  ;;  %s973_s30 = scalar_lea.vmem %s972_s16, 4096 }
  0x40   : > { %757 = vmatpush3.msra.mxu0 %v302_v2  ;;  %826 = vmatpush3.msra.mxu1 %v302_v2  ;;  %v273_v16 = vld [vmem:[%s1196_s20] sm:$0xff]  ;;  %v274_v18 = vld [vmem:[%s1196_s20 + $0x8] sm:$0xff]  ;;  %v283_v21 = vld [vmem:[%s1196_s20 + $0x50] sm:$0xff]  ;;  %p974_p5 = scmp.lt.s32.totalorder %s1265_s28, %s972_s16  ;;  %p975_p6 = scmp.lt.s32.totalorder %s973_s30, %s967_s8 }
  0x41   : > { %758 = vmatprep.subr.mxu0 %v301_v3  ;;  %811 = vmatprep.subr.mxu1 %v301_v3  ;;  %v281_v17 = vld [vmem:[%s1196_s20 + $0x40] sm:$0xff]  ;;  %v282_v19 = vld [vmem:[%s1196_s20 + $0x48] sm:$0xff]  ;;  %v276_v22 = vld [vmem:[%s1196_s20 + $0x18] sm:$0xff]  ;;  %p970_p2 = pneg %p969_p0 }
  0x42   : > { %759 = vmatpush3.msra.mxu0 %v301_v3  ;;  %827 = vmatpush3.msra.mxu1 %v301_v3  ;;  %v284_v23 = vld [vmem:[%s1196_s20 + $0x58] sm:$0xff]  ;;  %v277_v24 = vld [vmem:[%s1196_s20 + $0x20] sm:$0xff]  ;;  %v278_v26 = vld [vmem:[%s1196_s20 + $0x28] sm:$0xff]  ;;  %p976_p4 = por %p975_p6, %p974_p5 }
  0x43   : > { %760 = vmatprep.subr.mxu0 %v300_v4  ;;  %812 = vmatprep.subr.mxu1 %v300_v4  ;;  %v285_v25 = vld [vmem:[%s1196_s20 + $0x60] sm:$0xff]  ;;  %v286_v27 = vld [vmem:[%s1196_s20 + $0x68] sm:$0xff]  ;;  %v279_v28 = vld [vmem:[%s1196_s20 + $0x30] sm:$0xff] }
  0x44   : > { %761 = vmatpush3.msra.mxu0 %v300_v4  ;;  %828 = vmatpush3.msra.mxu1 %v300_v4  ;;  %v287_v29 = vld [vmem:[%s1196_s20 + $0x70] sm:$0xff]  ;;  %v280_v30 = vld [vmem:[%s1196_s20 + $0x38] sm:$0xff]  ;;  %p977_p7 = pnand %p976_p4, %p970_p2 }
  0x45   : > { %762 = vmatprep.subr.mxu0 %v299_v5  ;;  %813 = vmatprep.subr.mxu1 %v299_v5  ;;  %v288_v31 = vld [vmem:[%s1196_s20 + $0x78] sm:$0xff] }
  0x46   : > { %763 = vmatpush3.msra.mxu0 %v299_v5  ;;  %829 = vmatpush3.msra.mxu1 %v299_v5 }
  0x47   : > { %764 = vmatprep.subr.mxu0 %v298_v6  ;;  %814 = vmatprep.subr.mxu1 %v298_v6 }
  0x48   : > { %765 = vmatpush3.msra.mxu0 %v298_v6  ;;  %830 = vmatpush3.msra.mxu1 %v298_v6 }
  0x49   : > { %766 = vmatprep.subr.mxu0 %v297_v7  ;;  %815 = vmatprep.subr.mxu1 %v297_v7 }
  0x4a   : > { %767 = vmatpush3.msra.mxu0 %v297_v7  ;;  %831 = vmatpush3.msra.mxu1 %v297_v7 }
  0x4b   : > { %768 = vmatprep.subr.mxu0 %v296_v8  ;;  %816 = vmatprep.subr.mxu1 %v296_v8 }
  0x4c   : > { %769 = vmatpush3.msra.mxu0 %v296_v8  ;;  %832 = vmatpush3.msra.mxu1 %v296_v8 }
  0x4d   : > { %770 = vmatprep.subr.mxu0 %v295_v9  ;;  %817 = vmatprep.subr.mxu1 %v295_v9 }
  0x4e   : > { %771 = vmatpush3.msra.mxu0 %v295_v9  ;;  %833 = vmatpush3.msra.mxu1 %v295_v9 }
  0x4f   : > { %772 = vmatprep.subr.mxu0 %v294_v10  ;;  %818 = vmatprep.subr.mxu1 %v294_v10 }
  0x50   : > { %773 = vmatpush3.msra.mxu0 %v294_v10  ;;  %834 = vmatpush3.msra.mxu1 %v294_v10 }
  0x51   : > { %774 = vmatprep.subr.mxu0 %v293_v11  ;;  %819 = vmatprep.subr.mxu1 %v293_v11 }
  0x52   : > { %775 = vmatpush3.msra.mxu0 %v293_v11  ;;  %835 = vmatpush3.msra.mxu1 %v293_v11 }
  0x53   : > { %776 = vmatprep.subr.mxu0 %v292_v12  ;;  %820 = vmatprep.subr.mxu1 %v292_v12 }
  0x54   : > { %777 = vmatpush3.msra.mxu0 %v292_v12  ;;  %836 = vmatpush3.msra.mxu1 %v292_v12 }
  0x55   : > { %778 = vmatprep.subr.mxu0 %v291_v13  ;;  %821 = vmatprep.subr.mxu1 %v291_v13 }
  0x56   : > { %779 = vmatpush3.msra.mxu0 %v291_v13  ;;  %837 = vmatpush3.msra.mxu1 %v291_v13 }
  0x57   : > { %780 = vmatprep.subr.mxu0 %v290_v14  ;;  %822 = vmatprep.subr.mxu1 %v290_v14 }
  0x58   : > { %781 = vmatpush3.msra.mxu0 %v290_v14  ;;  %838 = vmatpush3.msra.mxu1 %v290_v14 }
  0x59   : > { %782 = vmatprep.subr.mxu0 %v289_v15  ;;  %823 = vmatprep.subr.mxu1 %v289_v15 }
  0x5a   : > { %783 = vmatpush3.msra.mxu0 %v289_v15  ;;  %839 = vmatpush3.msra.mxu1 %v289_v15 }
  0x5b   : > { %784 = vmatprep.mubr.f32.mxu0 %v273_v16  ;;  %796 = vmatprep.mubr.f32.mxu1 %v281_v17 }
  0x5c   : > { %785 = vmatmul.mubr.f32.vlgmr.msra.gmra.mxu0 %v274_v18  ;;  %797 = vmatmul.mubr.f32.vlgmr.msra.gmra.mxu1 %v282_v19 }
  0x5d   : > { %787 = vmatprep.mubr.f32.mxu0 %v275_v20  ;;  %799 = vmatprep.mubr.f32.mxu1 %v283_v21 }
  0x60   : > { %788 = vmatmul.mubr.f32.gmra.mxu0 %v276_v22  ;;  %800 = vmatmul.mubr.f32.gmra.mxu1 %v284_v23 }
  0x61   : > { %790 = vmatprep.mubr.f32.mxu0 %v277_v24  ;;  %802 = vmatprep.mubr.f32.mxu1 %v285_v25 }
  0x64   : > { %791 = vmatmul.mubr.f32.gmra.mxu0 %v278_v26  ;;  %803 = vmatmul.mubr.f32.gmra.mxu1 %v286_v27 }
  0x65   : > { %793 = vmatprep.mubr.f32.mxu0 %v279_v28  ;;  %805 = vmatprep.mubr.f32.mxu1 %v287_v29 }
  0x68   : > { %794 = vmatmul.mubr.f32.gmra.mxu0 %v280_v30  ;;  %806 = vmatmul.mubr.f32.gmra.mxu1 %v288_v31 }
 0x11c   : > { %v786_v32 = vpop.f32.mrf.mxu0  ;;  %v798_v33 = vpop.f32.mrf.mxu1 }
 0x11d   : > { %vm502_vm0 = vcmp.gt.f32.partialorder %v786_v32, 0.0  ;;  %v518_v34 = vmul.f32 0.2, %v786_v32  ;;  %vm510_vm1 = vcmp.gt.f32.partialorder %v798_v33, 0.0  ;;  %v526_v35 = vmul.f32 0.2, %v798_v33 }
 0x11e   : > { %v371_v36 = vpop.f32.mrf.mxu0  ;;  %v411_v37 = vpop.f32.mrf.mxu1 }
 0x11f   : > { %v534_v38 = vsel %vm502_vm0, %v786_v32, %v518_v34  ;;  %v542_v39 = vsel %vm510_vm1, %v798_v33, %v526_v35  ;;  %vm501_vm2 = vcmp.gt.f32.partialorder %v371_v36, 0.0  ;;  %v517_v40 = vmul.f32 0.2, %v371_v36 }
 0x120   : > { %550 = vst [vmem:[%s1243_s21 + $0x8] sm:$0xff] %v534_v38  ;;  %558 = vst [vmem:[%s1243_s21 + $0x48] sm:$0xff] %v542_v39  ;;  %vm509_vm3 = vcmp.gt.f32.partialorder %v411_v37, 0.0  ;;  %v525_v41 = vmul.f32 0.2, %v411_v37  ;;  %v789_v42 = vpop.f32.mrf.mxu0  ;;  %v801_v43 = vpop.f32.mrf.mxu1 }
 0x121   : > { %v533_v44 = vsel %vm501_vm2, %v371_v36, %v517_v40  ;;  %vm504_vm4 = vcmp.gt.f32.partialorder %v789_v42, 0.0  ;;  %v520_v45 = vmul.f32 0.2, %v789_v42  ;;  %vm512_vm5 = vcmp.gt.f32.partialorder %v801_v43, 0.0 }
 0x122   : > { %549 = vst [vmem:[%s1243_s21] sm:$0xff] %v533_v44  ;;  %v541_v46 = vsel %vm509_vm3, %v411_v37, %v525_v41  ;;  %v528_v47 = vmul.f32 0.2, %v801_v43  ;;  %v381_v48 = vpop.f32.mrf.mxu0  ;;  %v421_v49 = vpop.f32.mrf.mxu1 }
 0x123   : > { %557 = vst [vmem:[%s1243_s21 + $0x40] sm:$0xff] %v541_v46  ;;  %v536_v50 = vsel %vm504_vm4, %v789_v42, %v520_v45  ;;  %vm503_vm6 = vcmp.gt.f32.partialorder %v381_v48, 0.0  ;;  %v519_v51 = vmul.f32 0.2, %v381_v48  ;;  %vm511_vm7 = vcmp.gt.f32.partialorder %v421_v49, 0.0 }
 0x124   : > { %552 = vst [vmem:[%s1243_s21 + $0x18] sm:$0xff] %v536_v50  ;;  %v544_v52 = vsel %vm512_vm5, %v801_v43, %v528_v47  ;;  %v527_v53 = vmul.f32 0.2, %v421_v49  ;;  %v792_v54 = vpop.f32.mrf.mxu0  ;;  %v804_v55 = vpop.f32.mrf.mxu1 }
 0x125   : > { %560 = vst [vmem:[%s1243_s21 + $0x58] sm:$0xff] %v544_v52  ;;  %v535_v56 = vsel %vm503_vm6, %v381_v48, %v519_v51  ;;  %vm506_vm8 = vcmp.gt.f32.partialorder %v792_v54, 0.0  ;;  %v522_v57 = vmul.f32 0.2, %v792_v54  ;;  %vm514_vm9 = vcmp.gt.f32.partialorder %v804_v55, 0.0 }
 0x126   : > { %551 = vst [vmem:[%s1243_s21 + $0x10] sm:$0xff] %v535_v56  ;;  %v543_v58 = vsel %vm511_vm7, %v421_v49, %v527_v53  ;;  %v530_v59 = vmul.f32 0.2, %v804_v55  ;;  %v391_v60 = vpop.f32.mrf.mxu0  ;;  %v431_v61 = vpop.f32.mrf.mxu1 }
 0x127   : > { %559 = vst [vmem:[%s1243_s21 + $0x50] sm:$0xff] %v543_v58  ;;  %v538_v62 = vsel %vm506_vm8, %v792_v54, %v522_v57  ;;  %vm505_vm10 = vcmp.gt.f32.partialorder %v391_v60, 0.0  ;;  %v521_v63 = vmul.f32 0.2, %v391_v60  ;;  %vm513_vm11 = vcmp.gt.f32.partialorder %v431_v61, 0.0 }
 0x128   : > { %554 = vst [vmem:[%s1243_s21 + $0x28] sm:$0xff] %v538_v62  ;;  %v546_v0 = vsel %vm514_vm9, %v804_v55, %v530_v59  ;;  %v529_v1 = vmul.f32 0.2, %v431_v61  ;;  %v795_v2 = vpop.f32.mrf.mxu0  ;;  %v807_v3 = vpop.f32.mrf.mxu1 }
 0x129   : > { %562 = vst [vmem:[%s1243_s21 + $0x68] sm:$0xff] %v546_v0  ;;  %v537_v4 = vsel %vm505_vm10, %v391_v60, %v521_v63  ;;  %vm508_vm12 = vcmp.gt.f32.partialorder %v795_v2, 0.0  ;;  %v524_v5 = vmul.f32 0.2, %v795_v2  ;;  %vm516_vm13 = vcmp.gt.f32.partialorder %v807_v3, 0.0 }
 0x12a   : > { %553 = vst [vmem:[%s1243_s21 + $0x20] sm:$0xff] %v537_v4  ;;  %v545_v6 = vsel %vm513_vm11, %v431_v61, %v529_v1  ;;  %v532_v7 = vmul.f32 0.2, %v807_v3  ;;  %v401_v8 = vpop.f32.mrf.mxu0  ;;  %v441_v9 = vpop.f32.mrf.mxu1 }
 0x12b   : > { %561 = vst [vmem:[%s1243_s21 + $0x60] sm:$0xff] %v545_v6  ;;  %v540_v10 = vsel %vm508_vm12, %v795_v2, %v524_v5  ;;  %vm507_vm14 = vcmp.gt.f32.partialorder %v401_v8, 0.0  ;;  %v523_v11 = vmul.f32 0.2, %v401_v8  ;;  %vm515_vm15 = vcmp.gt.f32.partialorder %v441_v9, 0.0 }
 0x12c   : > { %556 = vst [vmem:[%s1243_s21 + $0x38] sm:$0xff] %v540_v10  ;;  %v548_v12 = vsel %vm516_vm13, %v807_v3, %v532_v7  ;;  %v531_v13 = vmul.f32 0.2, %v441_v9 }
 0x12d   : > { %564 = vst [vmem:[%s1243_s21 + $0x78] sm:$0xff] %v548_v12  ;;  %v539_v14 = vsel %vm507_vm14, %v401_v8, %v523_v11 }
 0x12e   : > { %555 = vst [vmem:[%s1243_s21 + $0x30] sm:$0xff] %v539_v14  ;;  %v547_v15 = vsel %vm515_vm15, %v441_v9, %v531_v13 }
 0x12f   : > { %563 = vst [vmem:[%s1243_s21 + $0x70] sm:$0xff] %v547_v15 }
 0x130   : > { %980 = shalt.err (!%p977_p7)
}
 0x131   : > { %s981_s4 = scalar_lea.hbm %s1263_s3, 2048  ;;  %s985_s6 = scalar_lea.hbm %s1318_s2, 4096 }
 0x132   : > { %p982_p10 = scmp.ne.s32.totalorder %s1263_s3, %s981_s4  ;;  %p986_p3 = scmp.lt.s32.totalorder %s1263_s3, %s1318_s2 }
 0x133   : > { %p987_p8 = scmp.lt.s32.totalorder %s985_s6, %s981_s4 }
 0x134   : > { %p983_p1 = pnand %p982_p10, %p1126_p9 }
 0x135   : > { %p988_p0 = por %p987_p8, %p986_p3 }
 0x136   : > { %p984_p13 = pneg %p983_p1 }
 0x138   : > { %p989_p2 = pnand %p988_p0, %p984_p13 }
 0x13a   : > { %992 = shalt.err (!%p989_p2)
}
 0x13b   : > { %s1058_s18 = smov 128   ;;  %s1059_s21 = smov 8  }
 0x13c   : > { %844 = dma.vmem_to_hbm [thread:$0]  (%p1126_p9), %s1265_s28, 2048, %s1263_s3, %s566_s7, %s1058_s18, %s1058_s18, %s1059_s21  }
 0x13d PF: > { %s596_s19 = sand.u32 1, %s1031_s9   ;;  %p854_p5 = pnand %p701_p12, %p1133_p11 }
 0x13e   : > { %s597_s12 = scalar_lea.sflag [#allocation5], %s596_s19 }
 0x13f   : > { %p855_p6 = pneg %p854_p5 }
 0x141   : > { %1026 = dma.done.wait (%p855_p6), %s597_s12, 2048  }
 0x142   : > { %1028 = vsyncadd (%p855_p6), %s597_s12, 4294965248  ;;  %s21_s14 = sadd.s32 1, %s1051_s14   ;;  %s1325_s9 = smov %s1035_s10 }
 0x143   : > { %p18_p4 = scmp.ge.s32.totalorder %s21_s14, 4   ;;  %s1326_s10 = smov %s1039_s11 }
 0x144   : > { %s1327_s11 = smov %s1131_s23  ;;  %s1328_s12 = smov %s1047_s13 }
 0x145   : > { %s1329_s13 = smov %s1331_s17  ;;  %20 = sbr.rel (!%p18_p4) target bundleno = 8 (0x8), region = 94 }
 0x14a   :  { %602 = vsyncpa [#allocation4], 1 }
 0x14b   :  { %604 = vsyncpa [#allocation4 + $0x1], 1 }
 0x14c   :  { %605 = vsyncpa [#allocation7], 1 }
 0x14d   :  { %607 = vsyncpa [#allocation7 + $0x1], 1 }
 0x14e   :  { %608 = vsyncpa [#allocation5], 1 }
 0x14f   :  { %610 = vsyncpa [#allocation5 + $0x1], 1 }

</bundles_post_ra>
